<compile_context>
chip_gen: v7x
topology: tpu7x:2x2x1
jax: 0.10.0
libtpu: 0.0.40
codegen_flags: <defaults>
</compile_context>

<pallas_src>
import jax
import jax.numpy as jnp
from jax.experimental import pallas as pl
from jax.experimental.pallas import tpu as pltpu


def _linear_flatten_dot_kernel(x_ref, w_ref, o_ref):
    # All refs live in SMEM; everything below is scalar-unit work.
    x00 = x_ref[0, 0]
    x01 = x_ref[0, 1]
    x10 = x_ref[1, 0]
    x11 = x_ref[1, 1]

    # torch Linear weight layout: (out_features, in_features); y = x @ W.T
    w00 = w_ref[0, 0]
    w01 = w_ref[0, 1]
    w10 = w_ref[1, 0]
    w11 = w_ref[1, 1]

    y00 = x00 * w00 + x01 * w01   # y[0, 0]
    y01 = x00 * w10 + x01 * w11   # y[0, 1]
    y10 = x10 * w00 + x11 * w01   # y[1, 0]
    y11 = x10 * w10 + x11 * w11   # y[1, 1]

    # flatten(y) . flatten(y) == sum of element-wise squares of y
    o_ref[0, 0] = y00 * y00 + y01 * y01 + y10 * y10 + y11 * y11


@jax.jit
def model_forward(x, w):
    """x: (2, 2) f32, w: (2, 2) f32 (out_features, in_features) -> (1, 1) f32."""
    return pl.pallas_call(
        _linear_flatten_dot_kernel,
        out_shape=jax.ShapeDtypeStruct((1, 1), jnp.float32),
        in_specs=[
            pl.BlockSpec(memory_space=pltpu.MemorySpace.SMEM),  # x: 8 scalar words
            pl.BlockSpec(memory_space=pltpu.MemorySpace.SMEM),  # w: 8 scalar words
        ],
        out_specs=pl.BlockSpec(memory_space=pltpu.MemorySpace.SMEM),  # scalar out
    )(x, w)


if __name__ == "__main__":
    key = jax.random.PRNGKey(0)
    kx, kw = jax.random.split(key)

    # Input matching the module: x = torch.randn(2, 2)
    x = jax.random.normal(kx, (2, 2), dtype=jnp.float32)

    # Deterministic Linear(2, 2, bias=False) weight, shape (out_features, in_features).
    bound = 1.0 / jnp.sqrt(2.0)
    w = jax.random.uniform(kw, (2, 2), dtype=jnp.float32, minval=-bound, maxval=bound)

    out = model_forward(x, w)
    jax.block_until_ready(out)

    # Pure-JAX reference of the exact PyTorch semantics.
    y = x @ w.T
    v = y.reshape(-1)
    ref = jnp.dot(v, v)
    assert jnp.allclose(out[0, 0], ref, rtol=1e-5, atol=1e-5), (out, ref)

    print("KERNEL_OK")
</pallas_src>

<mosaic_0001>
module attributes {stable_mosaic.version = 11 : i64} {
  func.func @_linear_flatten_dot_kernel(%arg0: memref<2x2xf32, #tpu.memory_space<smem>>, %arg1: memref<2x2xf32, #tpu.memory_space<smem>>, %arg2: memref<1x1xf32, #tpu.memory_space<smem>>) attributes {dimension_semantics = [], scalar_prefetch = 0 : i64, scratch_operands = 0 : i64, tpu.core_type = #tpu.core_type<tc>} {
    %c0 = arith.constant 0 : index
    %c0_0 = arith.constant 0 : index
    %0 = memref.load %arg0[%c0, %c0_0] : memref<2x2xf32, #tpu.memory_space<smem>>
    %c0_1 = arith.constant 0 : index
    %c1 = arith.constant 1 : index
    %1 = memref.load %arg0[%c0_1, %c1] : memref<2x2xf32, #tpu.memory_space<smem>>
    %c1_2 = arith.constant 1 : index
    %c0_3 = arith.constant 0 : index
    %2 = memref.load %arg0[%c1_2, %c0_3] : memref<2x2xf32, #tpu.memory_space<smem>>
    %c1_4 = arith.constant 1 : index
    %c1_5 = arith.constant 1 : index
    %3 = memref.load %arg0[%c1_4, %c1_5] : memref<2x2xf32, #tpu.memory_space<smem>>
    %c0_6 = arith.constant 0 : index
    %c0_7 = arith.constant 0 : index
    %4 = memref.load %arg1[%c0_6, %c0_7] : memref<2x2xf32, #tpu.memory_space<smem>>
    %c0_8 = arith.constant 0 : index
    %c1_9 = arith.constant 1 : index
    %5 = memref.load %arg1[%c0_8, %c1_9] : memref<2x2xf32, #tpu.memory_space<smem>>
    %c1_10 = arith.constant 1 : index
    %c0_11 = arith.constant 0 : index
    %6 = memref.load %arg1[%c1_10, %c0_11] : memref<2x2xf32, #tpu.memory_space<smem>>
    %c1_12 = arith.constant 1 : index
    %c1_13 = arith.constant 1 : index
    %7 = memref.load %arg1[%c1_12, %c1_13] : memref<2x2xf32, #tpu.memory_space<smem>>
    %8 = arith.mulf %0, %4 : f32
    %9 = arith.mulf %1, %5 : f32
    %10 = arith.addf %8, %9 : f32
    %11 = arith.mulf %0, %6 : f32
    %12 = arith.mulf %1, %7 : f32
    %13 = arith.addf %11, %12 : f32
    %14 = arith.mulf %2, %4 : f32
    %15 = arith.mulf %3, %5 : f32
    %16 = arith.addf %14, %15 : f32
    %17 = arith.mulf %2, %6 : f32
    %18 = arith.mulf %3, %7 : f32
    %19 = arith.addf %17, %18 : f32
    %20 = arith.mulf %10, %10 : f32
    %21 = arith.mulf %13, %13 : f32
    %22 = arith.addf %20, %21 : f32
    %23 = arith.mulf %16, %16 : f32
    %24 = arith.addf %22, %23 : f32
    %25 = arith.mulf %19, %19 : f32
    %26 = arith.addf %24, %25 : f32
    %c0_14 = arith.constant 0 : index
    %c0_15 = arith.constant 0 : index
    %27 = memref.load %arg2[%c0_14, %c0_15] : memref<1x1xf32, #tpu.memory_space<smem>>
    memref.store %26, %arg2[%c0_14, %c0_15] : memref<1x1xf32, #tpu.memory_space<smem>>
    return
  }
}

</mosaic_0001>

<bundles_post_ra>
// kernel: model_forward.1
= control target key start
LH: loop header
LB: loop body
LE: loop exit
PB: predicated region body
PF: predicated region fallthrough
CT: control target
= control target key end

     0   :  { %7 = vsyncpa [#allocation3], 0  ;;  %s171_s0 = inlined_call_operand.hbm [shape: f32[2,2], index: 0, kind: input, shape index: {}]   ;;  %s172_s1 = inlined_call_operand.vmem [shape: f32[2,2], index: 1, kind: input, shape index: {}]   ;;  %s173_s2 = inlined_call_operand.hbm [shape: f32[1,1], index: 2, kind: output, shape index: {}]  }
   0x1   :  { %8 = vsyncpa [#allocation5], 0 }
   0x2   :  { %9 = vsyncpa [#allocation4], 0  ;;  %s24_s11 = sshll.u32 %s172_s1, 4  ;;  %s88_s14 = scalar_lea.hbm %s171_s0, 32  ;;  %s25_s11 = int_to_ptr.vmem [resolvable:$true] %s24_s11 }
   0x3   :  { %p89_p0 = scmp.ne.s32.totalorder %s171_s0, %s88_s14  ;;  %p92_p1 = scmp.lt.u32.totalorder %s88_s14, %s171_s0 }
   0x5   :  { %p94_p2 = pnand %p92_p1, %p89_p0 }
   0x7   :  { %97 = shalt.err (!%p94_p2)
}
   0x8   :  { %s126_s19 = smov [#allocation2]   ;;  %s98_s1 = scalar_lea.vmem %s25_s11, 32 }
   0x9   :  { %17 = dma.hbm_to_smem %s171_s0, 32, %s126_s19, [#allocation3]  }
   0xa   :  { %p99_p3 = scmp.ne.s32.totalorder %s25_s11, %s98_s1  ;;  %p103_p4 = scmp.lt.s32.totalorder %s25_s11, %s25_s11 }
   0xb   :  { %p104_p5 = scmp.lt.s32.totalorder %s98_s1, %s98_s1 }
   0xd   :  { %p105_p6 = por %p104_p5, %p103_p4 }
   0xf   :  { %p106_p7 = pnand %p105_p6, %p99_p3 }
  0x11   :  { %109 = shalt.err (!%p106_p7)
}
  0x12   :  { %s127_s22 = smov [#allocation6]  }
  0x13   :  { %27 = dma.vmem_to_smem %s25_s11, 32, %s127_s22, [#allocation5]  }
  0x14   :  { %120 = dma.done.wait [#allocation3], 32  }
  0x15   :  { %121 = vsyncadd [#allocation3], 4294967264 }
  0x16   :  { %122 = dma.done.wait [#allocation5], 32  }
  0x17   :  { %123 = vsyncadd [#allocation5], 4294967264 }
  0x18   :  { %34 = sfence }
  0x19   :  { %s35_s23 = sld [smem:[#allocation2]]  ;;  %s79_s24 = sld [smem:[#allocation2 + $0x1]] }
  0x1a   :  { %s39_s25 = sld [smem:[#allocation6]]  ;;  %s82_s26 = sld [smem:[#allocation6 + $0x1]] }
  0x1b   :  { %s83_s0 = sld [smem:[#allocation6 + $0x80]]  ;;  %s84_s27 = sld [smem:[#allocation6 + $0x81]] }
  0x1c   :  { %s80_s28 = sld [smem:[#allocation2 + $0x80]]  ;;  %s81_s29 = sld [smem:[#allocation2 + $0x81]] }
  0x1d   :  { %s110_s22 = scalar_lea.hbm %s173_s2, 16 }
  0x1e   :  { %p111_p8 = scmp.ne.s32.totalorder %s173_s2, %s110_s22  ;;  %p114_p9 = scmp.lt.u32.totalorder %s110_s22, %s173_s2 }
  0x20   :  { %s43_s30 = smul.f32 %s39_s25, %s35_s23  ;;  %p116_p10 = pnand %p114_p9, %p111_p8 }
  0x21   :  { %s44_s3 = smul.f32 %s82_s26, %s79_s24 }
  0x22   :  { %s46_s4 = smul.f32 %s83_s0, %s35_s23 }
  0x23   :  { %s47_s5 = smul.f32 %s84_s27, %s79_s24  ;;  %s45_s6 = sadd.f32 %s44_s3, %s43_s30 }
  0x24   :  { %s49_s7 = smul.f32 %s80_s28, %s39_s25 }
  0x25   :  { %s48_s8 = sadd.f32 %s47_s5, %s46_s4  ;;  %s50_s9 = smul.f32 %s82_s26, %s81_s29 }
  0x26   :  { %s52_s10 = smul.f32 %s83_s0, %s80_s28 }
  0x27   :  { %s51_s11 = sadd.f32 %s50_s9, %s49_s7  ;;  %s53_s12 = smul.f32 %s84_s27, %s81_s29 }
  0x28   :  { %s55_s13 = smul.f32 %s45_s6, %s45_s6 }
  0x29   :  { %s54_s14 = sadd.f32 %s53_s12, %s52_s10  ;;  %s56_s15 = smul.f32 %s48_s8, %s48_s8 }
  0x2a   :  { %s58_s16 = smul.f32 %s51_s11, %s51_s11 }
  0x2b   :  { %s57_s17 = sadd.f32 %s56_s15, %s55_s13  ;;  %s60_s18 = smul.f32 %s54_s14, %s54_s14 }
  0x2d   :  { %s59_s19 = sadd.f32 %s58_s16, %s57_s17 }
  0x2f   :  { %s61_s20 = sadd.f32 %s60_s18, %s59_s19 }
  0x31   :  { %63 = sst [smem:[#allocation7]] %s61_s20 }
  0x32   :  { %119 = shalt.err (!%p116_p10)
}
  0x33   :  { %s128_s0 = smov [#allocation7]  }
  0x34   :  { %71 = dma.smem_to_hbm %s128_s0, 16, %s173_s2, [#allocation4]  }
  0x35   :  { %124 = dma.done.wait [#allocation4], 16  }
  0x36   :  { %125 = vsyncadd [#allocation4], 4294967280 }
  0x37   :  { %75 = sfence }
  0x38   :  { %76 = vsyncpa [#allocation3], 1 }
  0x39   :  { %77 = vsyncpa [#allocation4], 1 }
  0x3a   :  { %78 = vsyncpa [#allocation5], 1 }

</bundles_post_ra>
